<compile_context>
chip_gen: v7x
topology: tpu7x:2x2x1
jax: 0.10.0
libtpu: 0.0.40
codegen_flags: <defaults>
</compile_context>

<pallas_src>
import functools
import math

import jax
import jax.numpy as jnp
from jax.experimental import pallas as pl
from jax.experimental.pallas import tpu as pltpu


# ---------------------------------------------------------------------------
# Kernels
# ---------------------------------------------------------------------------

def _fold_matmul_kernel(x_ref, r_ref, o_ref):
    """One matmul against a block-diagonal one-hot R that already encodes the
    W replication, the H replication and the row->lane folding.  Output is
    produced directly in its (lane-dense) folded layout -> single dense store."""
    _, cb, th, kin = x_ref.shape
    kout = r_ref.shape[-1]
    z = x_ref[0].reshape(cb * th, kin)
    out = jnp.dot(z, r_ref[...], preferred_element_type=o_ref.dtype)
    o_ref[0] = out.reshape(cb, th, kout)


def _hoist_matmul_kernel(x_ref, r_ref, o_ref, *, scale_h: int, strided_h_store: bool):
    """W replication on the MXU with un-replicated rows (minimal MACs); the sh
    H-replicas are then written with sublane-strided stores (32-bit dtypes)."""
    _, cb, th, wt = x_ref.shape
    wo = r_ref.shape[-1]                                    # wt * scale_w
    z = x_ref[0].reshape(cb * th, wt)
    out = jnp.dot(z, r_ref[...], preferred_element_type=o_ref.dtype)
    out = out.reshape(cb, th, wo)
    if scale_h == 1:
        o_ref[0] = out
    elif strided_h_store:
        # Output row i of the block equals out[:, i // scale_h, :]; a strided vst
        # per replica keeps this in the store slots (no XLU/VPU relayout).
        val = out.reshape(1, cb, th, wo)
        for r in range(scale_h):
            o_ref[:, :, pl.ds(r, th, stride=scale_h), :] = val
    else:
        # Packed (sub-32-bit) dtypes: broadcast+reshape fallback (relayout copy).
        # TODO(synk): use the pltpu.bitcast duplicate-pack trick for 16-bit dtypes.
        y = jnp.broadcast_to(out[:, :, None, :], (cb, th, scale_h, wo))
        o_ref[0] = y.reshape(cb, th * scale_h, wo)


def _vpu_repeat_kernel(x_ref, o_ref, *, scale_h: int, scale_w: int):
    """Fallback for dtypes with no portable MXU path (integers, f64, ...)."""
    # TODO(synk): int8 could use the MXU selection matmul on v5e/v6e (integer MXU
    # exists there); kept on the VPU/XLU path because v7x has no integer MXU.
    _, cb, th, w = x_ref.shape
    z = x_ref[0].reshape(cb * th, w)
    z = jnp.broadcast_to(z[:, None, :], (cb * th, scale_h, w))
    z = z.reshape(cb * th * scale_h, w)
    y = jnp.repeat(z, scale_w, axis=-1)
    o_ref[0] = y.reshape(cb, th * scale_h, w * scale_w)


# ---------------------------------------------------------------------------
# Wrapper helpers
# ---------------------------------------------------------------------------

def _vmem_budgets():
    """(output-tile byte budget, vmem_limit_bytes), scaled by the chip's VMEM."""
    try:
        cap = getattr(pltpu.get_tpu_info(), "vmem_capacity_bytes", None)
    except Exception:  # query unavailable (e.g. CPU interpret) -> conservative
        cap = None
    if cap is None:
        return 2 * 1024 * 1024, 32 * 1024 * 1024
    if cap <= 64 * 1024 * 1024:                      # v7x-class: 64 MiB per TC
        return 3 * 1024 * 1024, 48 * 1024 * 1024
    return 6 * 1024 * 1024, 64 * 1024 * 1024         # v5e/v6e: 128 MiB


def _sublane_pack(itemsize: int) -> int:
    # 8 rows/vreg-tile for 4-byte dtypes, 16 for 2-byte, 32 for 1-byte.
    return 8 * max(1, 4 // itemsize)


def _choose_tiles(C, rows, out_bytes_per_row_per_chan, budget, pack):
    """Pick (cb, th): channel block and row block of the kernel's H axis.
    th is a multiple of the sublane packing or the full extent ((8,128) rule)."""
    budget_rows = max(1, budget // max(1, out_bytes_per_row_per_chan))
    if budget_rows >= C * rows:
        return C, rows
    if budget_rows >= rows:
        return max(1, min(C, budget_rows // rows)), rows
    th = min(rows, max(pack, (budget_rows // pack) * pack))
    return 1, th


def _ensure_multistep(other_steps, C, rows, cb, th, pack):
    """Megacore (v7x): make sure the grid has >= 2 steps so both TCs get work."""
    if other_steps * pl.cdiv(C, cb) * pl.cdiv(rows, th) >= 2:
        return cb, th
    if C > 1:
        return math.ceil(C / 2), th
    half = math.ceil(math.ceil(rows / 2) / pack) * pack
    if half < rows:
        return cb, half
    return cb, th


def _fold_factor(H, W, sh, sw, itemsize, lane_target=256, r_budget=2 * 1024 * 1024):
    """Smallest divisor k2 of H whose folded output width k2*sh*W*sw reaches the
    lane target (and whose one-hot matrix fits a small VMEM budget)."""
    wo = W * sw
    if sh * wo >= lane_target:
        return 1
    need = math.ceil(lane_target / (sh * wo))

    def r_bytes(k):
        return (k * W) * (k * sh * wo) * itemsize

    divisors = [d for d in range(1, H + 1) if H % d == 0]
    for d in divisors:                                # ascending
        if d >= need and r_bytes(d) <= r_budget:
            return d
    best = 1
    for d in divisors:                                # largest one that still fits
        if r_bytes(d) <= r_budget:
            best = d
    return best


# ---------------------------------------------------------------------------
# Public entry point
# ---------------------------------------------------------------------------

def upsample_nearest(x: jax.Array, scale_factor) -> jax.Array:
    """Equivalent of F.interpolate(x, scale_factor=..., mode='nearest') for
    positive integer (per-axis) scale factors on NCHW inputs."""
    if x.ndim != 4:
        raise NotImplementedError("Only 4-D NCHW inputs are supported.")
    if isinstance(scale_factor, (tuple, list)):
        sf = tuple(scale_factor)
        if len(sf) == 1:
            sf = (sf[0], sf[0])
    else:
        sf = (scale_factor, scale_factor)
    if len(sf) != 2:
        raise NotImplementedError("Expected one scale factor per spatial dim (2).")
    scales = []
    for s in sf:
        si = int(round(float(s)))
        if abs(float(s) - si) > 1e-9 or si < 1:
            # TODO(synk): fractional scale factors / `size=` need per-row gather indices.
            raise NotImplementedError("Only positive integer scale factors are supported.")
        scales.append(si)
    sh, sw = scales

    N, C, H, W = x.shape
    Ho, Wo = H * sh, W * sw
    if sh == 1 and sw == 1:
        return x

    dtype = x.dtype
    itemsize = jnp.dtype(dtype).itemsize
    pack = _sublane_pack(itemsize)
    out_budget, vmem_limit = _vmem_budgets()
    bytes_accessed = (N * C * H * W + N * C * Ho * Wo) * itemsize

    # MXU selection-matmul paths for f32/bf16 (exact: R is one-hot).
    # TODO(synk): f16 / fp8-on-v7x could also be admitted here.
    use_mxu = dtype in (jnp.float32, jnp.bfloat16)
    # Hoisted path needs lane-dense natural output and unpacked (32-bit) strided
    # stores; bf16 / small-Wo inputs go through the fold path instead.
    use_hoist = use_mxu and Wo >= 128 and itemsize == 4

    if use_hoist:
        wt_pref = 128                                   # f32 contraction tile (item 2)
        wt = wt_pref if (W > wt_pref and W % wt_pref == 0) else W
        nw = W // wt
        # One-hot replication matrix for a single K block; all diagonal blocks of
        # the full (W, Wo) matrix are identical, so one small resident block
        # (constant index map) is enough.
        r = (jnp.arange(wt)[:, None] == (jnp.arange(wt * sw)[None, :] // sw)).astype(dtype)
        r_bytes = wt * wt * sw * itemsize
        budget = max(512 * 1024, out_budget - 2 * r_bytes)

        cb, th = _choose_tiles(C, H, sh * wt * sw * itemsize, budget, pack)
        cb, th = _ensure_multistep(N * nw, C, H, cb, th, pack)
        grid = (N, pl.cdiv(C, cb), pl.cdiv(H, th), nw)

        kernel = functools.partial(_hoist_matmul_kernel, scale_h=sh, strided_h_store=True)
        return pl.pallas_call(
            kernel,
            out_shape=jax.ShapeDtypeStruct((N, C, Ho, Wo), dtype),
            grid=grid,
            in_specs=[
                pl.BlockSpec((1, cb, th, wt), lambda n, c, h, w: (n, c, h, w)),
                pl.BlockSpec((wt, wt * sw), lambda n, c, h, w: (0, 0)),
            ],
            out_specs=pl.BlockSpec((1, cb, th * sh, wt * sw),
                                   lambda n, c, h, w: (n, c, h, w)),
            # TODO(synk): sweep pipeline_mode=pl.Buffered(3) on the output spec /
            # Buffered(1) on R once measured (review item 10).
            compiler_params=pltpu.CompilerParams(
                dimension_semantics=("parallel",) * 4,
                vmem_limit_bytes=vmem_limit),
            cost_estimate=pl.CostEstimate(
                flops=2 * N * C * H * Wo * wt, transcendentals=0,
                bytes_accessed=bytes_accessed),
        )(x, r)

    if use_mxu:
        # Fold path: k2 input rows (and the sh replicas) are folded into the lane
        # dim.  Both reshapes below are free (row-major contiguous), the kernel is
        # a single matmul and the output block's last dim is lane-dense.
        k2 = _fold_factor(H, W, sh, sw, itemsize)
        hf = H // k2
        kin, kout = k2 * W, k2 * sh * Wo
        # R_bd[q*W + w, (q*sh + r)*Wo + j] = (j // sw == w); zero off the diagonal.
        row_q = jnp.arange(kin) // W
        row_w = jnp.arange(kin) % W
        col = jnp.arange(kout)
        col_q = col // (sh * Wo)
        col_j = col % Wo
        r = ((row_q[:, None] == col_q[None, :]) &
             (row_w[:, None] == (col_j[None, :] // sw))).astype(dtype)
        budget = max(512 * 1024, out_budget - 2 * kin * kout * itemsize)

        x_view = x.reshape(N, C, hf, kin)               # free wrapper-side reshape
        cb, th = _choose_tiles(C, hf, kout * itemsize, budget, pack)
        cb, th = _ensure_multistep(N, C, hf, cb, th, pack)
        grid = (N, pl.cdiv(C, cb), pl.cdiv(hf, th))

        # TODO(synk): very large W on this path keeps the full-W contraction (K is
        # only tiled on the hoisted f32 path); bf16 huge-W would want the
        # strided/bitcast H-store to enable K tiling as well.
        out_view = pl.pallas_call(
            _fold_matmul_kernel,
            out_shape=jax.ShapeDtypeStruct((N, C, hf, kout), dtype),
            grid=grid,
            in_specs=[
                pl.BlockSpec((1, cb, th, kin), lambda n, c, h: (n, c, h, 0)),
                pl.BlockSpec((kin, kout), lambda n, c, h: (0, 0)),
            ],
            out_specs=pl.BlockSpec((1, cb, th, kout), lambda n, c, h: (n, c, h, 0)),
            compiler_params=pltpu.CompilerParams(
                dimension_semantics=("parallel",) * 3,
                vmem_limit_bytes=vmem_limit),
            cost_estimate=pl.CostEstimate(
                flops=2 * N * C * Ho * Wo * kin, transcendentals=0,
                bytes_accessed=bytes_accessed),
        )(x_view, r)
        # Folded layout is exactly the row-major layout of (N, C, Ho, Wo).
        return out_view.reshape(N, C, Ho, Wo)

    # ---- VPU fallback (integer / unsupported float dtypes) ----
    cb, th = _choose_tiles(C, H, sh * Wo * itemsize, out_budget, pack)
    cb, th = _ensure_multistep(N, C, H, cb, th, pack)
    grid = (N, pl.cdiv(C, cb), pl.cdiv(H, th))
    kernel = functools.partial(_vpu_repeat_kernel, scale_h=sh, scale_w=sw)
    return pl.pallas_call(
        kernel,
        out_shape=jax.ShapeDtypeStruct((N, C, Ho, Wo), dtype),
        grid=grid,
        in_specs=[pl.BlockSpec((1, cb, th, W), lambda n, c, h: (n, c, h, 0))],
        out_specs=pl.BlockSpec((1, cb, th * sh, Wo), lambda n, c, h: (n, c, h, 0)),
        compiler_params=pltpu.CompilerParams(
            dimension_semantics=("parallel",) * 3,
            vmem_limit_bytes=vmem_limit),
        cost_estimate=pl.CostEstimate(
            flops=0, transcendentals=0, bytes_accessed=bytes_accessed),
    )(x)


# ---------------------------------------------------------------------------
# Test
# ---------------------------------------------------------------------------

def _reference_upsample_nearest(x: jax.Array, sh: int, sw: int) -> jax.Array:
    y = jnp.repeat(x, sh, axis=2)
    y = jnp.repeat(y, sw, axis=3)
    return y


if __name__ == "__main__":
    key = jax.random.PRNGKey(0)
    cases = [
        # (shape, scale_factor, dtype)
        ((2, 4, 16, 16), 2, jnp.float32),        # small-W fold path (primary spec shape)
        ((2, 4, 16, 16), (1, 2), jnp.float32),   # asymmetric scale, fold path
        ((2, 4, 16, 16), 2, jnp.bfloat16),       # bf16 fold path (no f32 intermediate)
        ((1, 2, 8, 128), 2, jnp.float32),        # hoisted path: strided H stores
        ((1, 2, 8, 256), 2, jnp.float32),        # hoisted path with W-tiled (K) matmul
    ]
    for shape, sf, dt in cases:
        key, sub = jax.random.split(key)
        x = jax.random.normal(sub, shape, dtype=jnp.float32).astype(dt)
        out = jax.block_until_ready(upsample_nearest(x, sf))
        sh, sw = (sf, sf) if not isinstance(sf, tuple) else sf
        ref = _reference_upsample_nearest(x, sh, sw)
        assert out.shape == ref.shape, (shape, sf, out.shape, ref.shape)
        assert out.dtype == x.dtype, (out.dtype, x.dtype)
        ok = jnp.allclose(out.astype(jnp.float32), ref.astype(jnp.float32),
                          rtol=1e-5, atol=1e-6)
        assert bool(ok), f"Pallas nearest-upsample mismatch for {shape} scale {sf} {dt}"

    print("KERNEL_OK")
</pallas_src>

<mosaic_0001>
module attributes {stable_mosaic.version = 11 : i64} {
  func.func @_fold_matmul_kernel(%arg0: i32, %arg1: i32, %arg2: i32, %arg3: memref<1x4x4x64xf32, #tpu.memory_space<vmem>>, %arg4: memref<64x256xf32, #tpu.memory_space<vmem>>, %arg5: memref<1x4x4x256xf32, #tpu.memory_space<vmem>>) attributes {dimension_semantics = [#tpu.dimension_semantics<parallel>, #tpu.dimension_semantics<parallel>, #tpu.dimension_semantics<parallel>], iteration_bounds = array<i64: 2, 1, 1>, scalar_prefetch = 0 : i64, scratch_operands = 0 : i64, tpu.core_type = #tpu.core_type<tc>, window_params = [{transform_indices = @transform_0, window_bounds = array<i64: 1, 4, 4, 64>}, {pipeline_mode = #tpu.pipeline_mode<synchronous>, transform_indices = @transform_1, window_bounds = array<i64: 64, 256>}, {transform_indices = @transform_2, window_bounds = array<i64: 1, 4, 4, 256>}]} {
    %c0 = arith.constant 0 : index
    %c0_0 = arith.constant 0 : index
    %c0_1 = arith.constant 0 : index
    %c0_2 = arith.constant 0 : index
    %0 = vector.load %arg3[%c0, %c0_0, %c0_1, %c0_2] : memref<1x4x4x64xf32, #tpu.memory_space<vmem>>, vector<1x4x4x64xf32>
    %1 = vector.shape_cast %0 : vector<1x4x4x64xf32> to vector<4x4x64xf32>
    %2 = vector.shape_cast %1 : vector<4x4x64xf32> to vector<16x64xf32>
    %c0_3 = arith.constant 0 : index
    %c0_4 = arith.constant 0 : index
    %3 = vector.load %arg4[%c0_3, %c0_4] : memref<64x256xf32, #tpu.memory_space<vmem>>, vector<64x256xf32>
    %cst = arith.constant dense<0.000000e+00> : vector<16x256xf32>
    %4 = tpu.matmul %2, %3, %cst {dimension_numbers = #tpu.dot_dimension_numbers<[1], [0], [0], [1], [0, 0, 1, 1], [], []>} : vector<16x64xf32>, vector<64x256xf32>, vector<16x256xf32> -> vector<16x256xf32>
    %5 = vector.shape_cast %4 : vector<16x256xf32> to vector<4x4x256xf32>
    %c0_5 = arith.constant 0 : index
    %c0_6 = arith.constant 0 : index
    %c0_7 = arith.constant 0 : index
    %c0_8 = arith.constant 0 : index
    %6 = vector.load %arg5[%c0_5, %c0_6, %c0_7, %c0_8] : memref<1x4x4x256xf32, #tpu.memory_space<vmem>>, vector<1x4x4x256xf32>
    %7 = vector.shape_cast %6 : vector<1x4x4x256xf32> to vector<4x4x256xf32>
    %8 = vector.shape_cast %5 : vector<4x4x256xf32> to vector<1x4x4x256xf32>
    tpu.vector_store %arg5[%c0_5, %c0_6, %c0_7, %c0_8], %8 {strides = array<i32>} : memref<1x4x4x256xf32, #tpu.memory_space<vmem>>, vector<1x4x4x256xf32>,
    return
  }
  func.func @transform_0(%arg0: i32, %arg1: i32, %arg2: i32) -> (i32, i32, i32, i32) {
    %c0_i32 = arith.constant 0 : i32
    %c0_i32_0 = arith.constant 0 : i32
    return %arg0, %arg1, %arg2, %c0_i32 : i32, i32, i32, i32
  }
  func.func @transform_1(%arg0: i32, %arg1: i32, %arg2: i32) -> (i32, i32) {
    %c0_i32 = arith.constant 0 : i32
    %c0_i32_0 = arith.constant 0 : i32
    %c0_i32_1 = arith.constant 0 : i32
    return %c0_i32, %c0_i32_0 : i32, i32
  }
  func.func @transform_2(%arg0: i32, %arg1: i32, %arg2: i32) -> (i32, i32, i32, i32) {
    %c0_i32 = arith.constant 0 : i32
    %c0_i32_0 = arith.constant 0 : i32
    return %arg0, %arg1, %arg2, %c0_i32 : i32, i32, i32, i32
  }
}

</mosaic_0001>

<bundles_post_ra>
// kernel: tpu_custom_call.1
= control target key start
LH: loop header
LB: loop body
LE: loop exit
PB: predicated region body
PF: predicated region fallthrough
CT: control target
= control target key end

     0   :  { %7 = vsyncpa [#allocation3], 0  ;;  %s977_s0 = inlined_call_operand.hbm [shape: f32[2,4,4,64], index: 0, kind: input, shape index: {}]   ;;  %s978_s1 = inlined_call_operand.hbm [shape: f32[64,256], index: 1, kind: input, shape index: {}]   ;;  %s979_s2 = inlined_call_operand.hbm [shape: f32[2,4,4,256], index: 2, kind: output, shape index: {}]  }
   0x1   :  { %9 = vsyncpa [#allocation3 + $0x1], 0 }
   0x2   :  { %10 = vsyncpa [#allocation6], 0 }
   0x3   :  { %11 = vsyncpa [#allocation4], 0 }
   0x4   :  { %13 = vsyncpa [#allocation4 + $0x1], 0  ;;  %s753_s9 = smov 0   ;;  %s755_s10 = smov 0  }
   0x5   :  { %s757_s11 = smov 0   ;;  %s759_s12 = smov 0  }
   0x6   :  { %s761_s13 = smov 0   ;;  %s763_s14 = smov 0  }
   0x7 LB: > { %s455_s15 = sadd.s32 4294967295, %s726_s14   ;;  %s456_s16 = sadd.s32 4294967294, %s726_s14   ;;  %s726_s14 = sphi %s763_s14, %s19_s14   ;;  %s722_s13 = sphi %s761_s13, %s1003_s13   ;;  %s718_s12 = sphi %s759_s12, %s1002_s12   ;;  %s714_s11 = sphi %s757_s11, %s1001_s11   ;;  %s710_s10 = sphi %s755_s10, %s1000_s10   ;;  %s706_s9 = sphi %s753_s9, %s999_s9  }
   0x8   : > { %p62_p0 = scmp.ne.s32.totalorder %s710_s10, %s706_s9  ;;  %p787_p1 = scmp.eq.s32.totalorder %s455_s15, 0 }
   0x9   : > { %p791_p2 = scmp.eq.s32.totalorder %s455_s15, 1  ;;  %p117_p3 = scmp.eq.s32.totalorder %s456_s16, 1 }
   0xa   : > { %s984_s17 = scalar_select %p787_p1, 1, 0 }
   0xb   : > { %s985_s18 = scalar_select %p791_p2, 1, 0 }
   0xc   : > { %p797_p4 = por %p787_p1, %p62_p0  ;;  %p457_p5 = scmp.ge.s32.totalorder %s726_s14, 1 }
   0xd   : > { %p802_p6 = por %p117_p3, %p62_p0  ;;  %p124_p7 = scmp.lt.s32.totalorder %s726_s14, 3 }
   0xe   : > { %s986_s19 = scalar_select %p797_p4, 1, 0 }
   0xf   : > { %s987_s20 = scalar_select %p802_p6, 1, 0 }
  0x10   : > { %p807_p8 = pnand %p457_p5, %p124_p7  ;;  %s728_s22 = smov [#allocation5]  }
  0x11   : > { %s136_s23 = sshll.u32 %s728_s22, 4  ;;  %s38_s25 = sadd.s32 1, %s722_s13  ;;  %s137_s23 = int_to_ptr.vmem [resolvable:$true] %s136_s23 }
  0x12   : > { %s988_s21 = scalar_select %p807_p8, 1, 0 }
  0x13   : > { %p508_p9 = pneg %p807_p8  ;;  %s582_s28 = scalar_lea.hbm %s978_s1, 2048 }
  0x14   : > { %p583_p12 = scmp.ne.s32.totalorder %s978_s1, %s582_s28  ;;  %p589_p5 = scmp.lt.u32.totalorder %s582_s28, %s978_s1 }
  0x15   : > { %p816_p11 = pnand %p508_p9, %p787_p1 }
  0x17   : > { %p584_p13 = pneg %p816_p11 }
  0x19   : > { %p585_p0 = pnand %p584_p13, %p583_p12 }
  0x1b   : > { %p586_p3 = pneg %p585_p0 }
  0x1d   : > { %p591_p7 = pnand %p589_p5, %p586_p3 }
  0x1f   : > { %594 = shalt.err (!%p591_p7)
}
  0x20   : > { %s595_s5 = scalar_lea.vmem %s137_s23, 2048  ;;  %p603_p1 = scmp.lt.s32.totalorder %s137_s23, %s137_s23 }
  0x21   : > { %p596_p9 = scmp.ne.s32.totalorder %s137_s23, %s595_s5  ;;  %p604_p4 = scmp.lt.s32.totalorder %s595_s5, %s595_s5 }
  0x23   : > { %p598_p10 = pnand %p596_p9, %p584_p13  ;;  %p605_p8 = por %p604_p4, %p603_p1 }
  0x25   : > { %p599_p6 = pneg %p598_p10 }
  0x27   : > { %p606_p2 = pnand %p605_p8, %p599_p6 }
  0x29   : > { %609 = shalt.err (!%p606_p2)
}
  0x2a   : > { %s729_s6 = smov 256   ;;  %s730_s7 = smov 16  }
  0x2b   : > { %511 = dma.hbm_to_vmem [thread:$0]  (!%p816_p11), %s978_s1, 2048, %s137_s23, [#allocation6], %s729_s6, %s729_s6, %s730_s7  }
  0x2c   : > { %p40_p1 = scmp.ge.s32.totalorder %s38_s25, 2  ;;  %s49_s16 = sadd.s32 1, %s714_s11 }
  0x2d   : > { %p56_p2 = scmp.ne.s32.totalorder %s714_s11, %s710_s10  ;;  %p57_p4 = scmp.eq.s32.totalorder %s726_s14, 0 }
  0x2e   : > { %s1005_s25 = smov (%p40_p1, %s38_s25), 0  ;;  %p991_p8 = scmp.ne.s32.totalorder %s985_s18, 0 }
  0x2f   : > { %p843_p6 = por %p57_p4, %p56_p2  ;;  %s42_s24 = ssub.s32 %s722_s13, %s1005_s25 }
  0x30   : > { %p849_p10 = por %p991_p8, %p56_p2  ;;  %p521_p12 = scmp.lt.s32.totalorder %s726_s14, 2 }
  0x31   : > { %p47_p11 = scmp.eq.s32.totalorder %s42_s24, 0  ;;  %s150_s23 = sand.u32 1, %s714_s11  }
  0x32   : > { %s460_s27 = sshll.u32 %s150_s23, 4  ;;  %s474_s29 = sshll.u32 %s722_s13, 8 }
  0x33   : > { %s858_s28 = scalar_select %p47_p11, %s714_s11, %s49_s16  }
  0x34   : > { %s864_s4 = scalar_lea.hbm %s977_s0, %s474_s29  ;;  %s154_s18 = scalar_lea.vmem [#allocation2], %s460_s27 }
  0x35   : > { %s164_s5 = sshll.u32 %s154_s18, 4  ;;  %p870_p13 = pnand %p521_p12, %p843_p6  ;;  %s866_s5 = int_to_ptr.vmem [resolvable:$true] %s164_s5 }
  0x36   : > { %s874_s7 = scalar_lea.sflag [#allocation3], %s150_s23  ;;  %s610_s8 = scalar_lea.hbm %s864_s4, 256 }
  0x37   : > { %p611_p0 = scmp.ne.s32.totalorder %s864_s4, %s610_s8  ;;  %p612_p3 = pneg %p870_p13 }
  0x38   : > { %s615_s22 = scalar_lea.hbm %s977_s0, 512  ;;  %p616_p9 = scmp.lt.u32.totalorder %s864_s4, %s977_s0 }
  0x39   : > { %p613_p5 = pnand %p612_p3, %p611_p0  ;;  %p617_p1 = scmp.lt.u32.totalorder %s615_s22, %s610_s8 }
  0x3a   : > { %p619_p4 = scmp.lt.u32.totalorder %s610_s8, %s864_s4 }
  0x3b   : > { %p614_p7 = pneg %p613_p5  ;;  %p618_p2 = por %p617_p1, %p616_p9 }
  0x3d   : > { %p620_p6 = por %p619_p4, %p618_p2 }
  0x3f   : > { %p621_p8 = pnand %p620_p6, %p614_p7 }
  0x41   : > { %624 = shalt.err (!%p621_p8)
}
  0x42   : > { %s625_s23 = scalar_lea.vmem %s866_s5, 256  ;;  %s731_s29 = smov [#allocation2]  }
  0x43   : > { %p626_p12 = scmp.ne.s32.totalorder %s866_s5, %s625_s23  ;;  %s630_s30 = sshll.u32 %s731_s29, 4  ;;  %s631_s30 = int_to_ptr.vmem [resolvable:$false] %s630_s30 }
  0x44   : > { %s632_s3 = scalar_lea.vmem %s631_s30, 512  ;;  %p633_p5 = scmp.lt.s32.totalorder %s866_s5, %s631_s30 }
  0x45   : > { %p628_p11 = pnand %p626_p12, %p612_p3  ;;  %p634_p9 = scmp.lt.s32.totalorder %s632_s3, %s625_s23 }
  0x47   : > { %p629_p0 = pneg %p628_p11  ;;  %p635_p1 = por %p634_p9, %p633_p5 }
  0x49   : > { %p636_p2 = pnand %p635_p1, %p629_p0 }
  0x4b   : > { %639 = shalt.err (!%p636_p2)
}
  0x4c   : > { %s732_s18 = smov 64   ;;  %s733_s8 = smov 4  }
  0x4d   : > { %515 = dma.hbm_to_vmem [thread:$0]  (!%p870_p13), %s864_s4, 256, %s866_s5, %s874_s7, %s732_s18, %s732_s18, %s733_s8  }
  0x4e   : > { %p994_p3 = scmp.ne.s32.totalorder %s988_s21, 0 }
  0x4f   : > { %s905_s15 = sand.u32 (!%p994_p3), 1, %s710_s10   ;;  %p995_p7 = scmp.ne.s32.totalorder (!%p994_p3), %s986_s19, 0 }
  0x50   : > { %176 = sbr.rel (%p994_p3) target bundleno = 341 (0x155), region = 28  ;;  %s464_s16 = sshll.u32 (!%p994_p3), %s905_s15, 4 }
  0x51   : > { %s179_s22 = scalar_lea.sflag (!%p994_p3), [#allocation3], %s905_s15  ;;  %s909_s24 = scalar_lea.vmem (!%p994_p3), [#allocation2], %s464_s16 }
  0x57   : > { %693 = dma.done.wait (%p995_p7), %s179_s22, 256  }
  0x58   : > { %695 = vsyncadd (%p995_p7), %s179_s22, 4294967040  ;;  %p996_p13 = scmp.ne.s32.totalorder %s984_s17, 0 }
  0x5a   : > { %697 = dma.done.wait (%p996_p13), [#allocation6], 2048  }
  0x5b   : > { %699 = vsyncadd (%p996_p13), [#allocation6], 4294965248  ;;  %v734_v0 = vmov 0.0   ;;  %v214_v1 = vld [vmem:[#allocation5 + $0x8] sm:$0xff]  ;;  %v216_v2 = vld [vmem:[#allocation5 + $0x18] sm:$0xff]  ;;  %vm235_vm0 = vcmask 523264  }
  0x5c   : > { %304 = vmatprep.mubr.f32.mxu0 %v734_v0  ;;  %310 = vmatprep.mubr.f32.mxu1 %v734_v0  ;;  %v213_v3 = vld [vmem:[#allocation5] sm:$0xff]  ;;  %v476_v4 = vpack.c.bf16 %v216_v2, %v214_v1  ;;  %v215_v5 = vld [vmem:[#allocation5 + $0x10] sm:$0xff]  ;;  %v218_v6 = vld [vmem:[#allocation5 + $0x28] sm:$0xff]  ;;  %s466_s17 = sshll.u32 %s905_s15, 5  ;;  %s475_s4 = sshll.u32 %s718_s12, 9 }
  0x5d   : > { %v220_v7 = vld [vmem:[#allocation5 + $0x38] sm:$0xff]  ;;  %v478_v8 = vpack.c.bf16 %v215_v5, %v213_v3  ;;  %v217_v10 = vld [vmem:[#allocation5 + $0x20] sm:$0xff]  ;;  %v219_v11 = vld [vmem:[#allocation5 + $0x30] sm:$0xff]  ;;  %s206_s19 = scalar_lea.vmem [#allocation7], %s466_s17  ;;  %s928_s7 = scalar_lea.hbm %s979_s2, %s475_s4 }
  0x5e   : > { %v480_v9 = vpack.c.bf16 %v220_v7, %v218_v6  ;;  %v222_v12 = vld [vmem:[#allocation5 + $0x48] sm:$0xff]  ;;  %477 = vmatprep.subr.bf16.mxu0 %v476_v4  ;;  %492 = vmatprep.subr.bf16.mxu1 %v476_v4  ;;  %v224_v13 = vld [vmem:[#allocation5 + $0x58] sm:$0xff]  ;;  %v482_v14 = vpack.c.bf16 %v219_v11, %v217_v10  ;;  %v221_v15 = vld [vmem:[#allocation5 + $0x40] sm:$0xff]  ;;  %s352_s21 = sshll.u32 %s206_s19, 4  ;;  %s334_s12 = scalar_lea.sflag [#allocation4], %s905_s15  ;;  %s923_s21 = int_to_ptr.vmem [resolvable:$true] %s352_s21 }
  0x5f   : > { %479 = vmatpush1.bf16.msra.mxu0 %v478_v8  ;;  %496 = vmatpush1.bf16.msra.mxu1 %v478_v8  ;;  %v223_v16 = vld [vmem:[#allocation5 + $0x50] sm:$0xff]  ;;  %v484_v17 = vpack.c.bf16 %v224_v13, %v222_v12  ;;  %v226_v18 = vld [vmem:[#allocation5 + $0x68] sm:$0xff]  ;;  %v228_v19 = vld [vmem:[#allocation5 + $0x78] sm:$0xff]  ;;  %s640_s27 = scalar_lea.vmem %s923_s21, 512  ;;  %s735_s23 = smov [#allocation7]  }
  0x60   : > { %481 = vmatprep.subr.bf16.mxu0 %v480_v9  ;;  %493 = vmatprep.subr.bf16.mxu1 %v480_v9  ;;  %v486_v20 = vpack.c.bf16 %v223_v16, %v221_v15  ;;  %v488_v21 = vpack.c.bf16 %v228_v19, %v226_v18  ;;  %v225_v22 = vld [vmem:[#allocation5 + $0x60] sm:$0xff]  ;;  %v227_v23 = vld [vmem:[#allocation5 + $0x70] sm:$0xff]  ;;  %v581_v26 = vld [vmem:[%s909_s24 + $0x8] sm:$0xff]   ;;  %p641_p4 = scmp.ne.s32.totalorder %s923_s21, %s640_s27  ;;  %s644_s29 = sshll.u32 %s735_s23, 4  ;;  %s645_s29 = int_to_ptr.vmem [resolvable:$false] %s644_s29 }
  0x61   : > { %v490_v24 = vpack.c.bf16 %v227_v23, %v225_v22  ;;  %v580_v25 = vld [vmem:[%s909_s24] sm:$0xff]   ;;  %s646_s30 = scalar_lea.vmem %s645_s29, 1024  ;;  %p647_p12 = scmp.lt.s32.totalorder %s923_s21, %s645_s29 }
  0x62   : > { %p642_p6 = pnand %p641_p4, %p849_p10  ;;  %p648_p11 = scmp.lt.s32.totalorder %s646_s30, %s640_s27 }
  0x63   : > { %483 = vmatpush1.bf16.msra.mxu0 %v482_v14  ;;  %497 = vmatpush1.bf16.msra.mxu1 %v482_v14 }
  0x64   : > { %485 = vmatprep.subr.bf16.mxu0 %v484_v17  ;;  %494 = vmatprep.subr.bf16.mxu1 %v484_v17  ;;  %p643_p8 = pneg %p642_p6  ;;  %p649_p0 = por %p648_p11, %p647_p12 }
  0x66   : > { %p650_p5 = pnand %p649_p0, %p643_p8 }
  0x67   : > { %487 = vmatpush1.bf16.msra.mxu0 %v486_v20  ;;  %498 = vmatpush1.bf16.msra.mxu1 %v486_v20 }
  0x68   : > { %489 = vmatprep.subr.bf16.mxu0 %v488_v21  ;;  %495 = vmatprep.subr.bf16.mxu1 %v488_v21 }
  0x6b   : > { %491 = vmatpush1.bf16.msra.mxu0 %v490_v24  ;;  %499 = vmatpush1.bf16.msra.mxu1 %v490_v24 }
  0x6e   : > { %467 = vmatmul.mubr.msk.f32.vlgmr.msra.gmra.mrb[0].mxu0 %vm235_vm0, %v580_v25  ;;  %468 = vmatmul.mubr.msk.f32.vlgmr.msra.gmra.mrb[0].mxu1 %vm235_vm0, %v581_v26 }
 0x141   : > { %v306_v27 = vpop.f32.mrb[0].mxu0  ;;  %v312_v28 = vpop.f32.mrb[0].mxu1 }
 0x142   : > { %v308_v29 = vpop.f32.mrb[1].mxu0  ;;  %v314_v30 = vpop.f32.mrb[1].mxu1 }
 0x143   : > { %v321_v31 = vcombine.low %v306_v27, %v308_v29  ;;  %v322_v32 = vcombine.high %v306_v27, %v308_v29  ;;  %v323_v33 = vcombine.low %v312_v28, %v314_v30  ;;  %v324_v34 = vcombine.high %v312_v28, %v314_v30 }
 0x145   : > { %329 = vst [vmem:[%s206_s19] sm:$0xff] %v321_v31  ;;  %330 = vst [vmem:[%s206_s19 + $0x8] sm:$0xff] %v322_v32 }
 0x146   : > { %331 = vst [vmem:[%s206_s19 + $0x10] sm:$0xff] %v323_v33  ;;  %332 = vst [vmem:[%s206_s19 + $0x18] sm:$0xff] %v324_v34 }
 0x147   : > { %653 = shalt.err (!%p650_p5)
}
 0x148   : > { %s654_s3 = scalar_lea.hbm %s928_s7, 512  ;;  %s658_s16 = scalar_lea.hbm %s979_s2, 1024 }
 0x149   : > { %p655_p9 = scmp.ne.s32.totalorder %s928_s7, %s654_s3  ;;  %p659_p3 = scmp.lt.u32.totalorder %s928_s7, %s979_s2 }
 0x14a   : > { %p660_p7 = scmp.lt.u32.totalorder %s658_s16, %s654_s3  ;;  %p662_p4 = scmp.lt.u32.totalorder %s654_s3, %s928_s7 }
 0x14b   : > { %p656_p1 = pnand %p655_p9, %p849_p10 }
 0x14c   : > { %p661_p13 = por %p660_p7, %p659_p3 }
 0x14d   : > { %p657_p2 = pneg %p656_p1 }
 0x14e   : > { %p663_p6 = por %p662_p4, %p661_p13 }
 0x150   : > { %p664_p8 = pnand %p663_p6, %p657_p2 }
 0x152   : > { %667 = shalt.err (!%p664_p8)
}
 0x153   : > { %s736_s17 = smov 128   ;;  %s737_s19 = smov 8  }
 0x154   : > { %506 = dma.vmem_to_hbm [thread:$0]  (%p849_p10), %s923_s21, 512, %s928_s7, %s334_s12, %s736_s17, %s736_s17, %s737_s19  }
 0x155 PF: > { %s367_s4 = sand.u32 1, %s706_s9   ;;  %p997_p12 = scmp.ne.s32.totalorder %s987_s20, 0 }
 0x156   : > { %p998_p11 = scmp.ge.s32.totalorder %s726_s14, 2  ;;  %s368_s5 = scalar_lea.sflag [#allocation4], %s367_s4 }
 0x158   : > { %p517_p0 = pnand %p998_p11, %p997_p12 }
 0x15a   : > { %701 = dma.done.wait (!%p517_p0), %s368_s5, 512  }
 0x15b   : > { %703 = vsyncadd (!%p517_p0), %s368_s5, 4294966784  ;;  %s19_s14 = sadd.s32 1, %s726_s14   ;;  %s999_s9 = smov %s710_s10 }
 0x15c   : > { %p16_p5 = scmp.ge.s32.totalorder %s19_s14, 4   ;;  %s1000_s10 = smov %s714_s11 }
 0x15d   : > { %s1001_s11 = smov %s858_s28  ;;  %s1002_s12 = smov %s722_s13 }
 0x15e   : > { %s1003_s13 = smov %s1005_s25  ;;  %18 = sbr.rel (!%p16_p5) target bundleno = 7 (0x7), region = 77 }
 0x165   :  { %373 = vsyncpa [#allocation3], 1 }
 0x166   :  { %375 = vsyncpa [#allocation3 + $0x1], 1 }
 0x167   :  { %376 = vsyncpa [#allocation6], 1 }
 0x168   :  { %377 = vsyncpa [#allocation4], 1 }
 0x169   :  { %379 = vsyncpa [#allocation4 + $0x1], 1 }

</bundles_post_ra>
